<compile_context>
chip_gen: v7x
topology: tpu7x:2x2x1
jax: 0.10.0
libtpu: 0.0.40
codegen_flags: <defaults>
</compile_context>

<pallas_src>
import math

import jax
import jax.numpy as jnp
from jax.experimental import pallas as pl
from jax.experimental.pallas import tpu as pltpu

# Sublane offset at which the GAP vector is stored inside the zero-padded
# staging scratch (8 keeps the store tile-aligned; taps read at offsets
# _GPAD - pad .. _GPAD + pad, pad <= 4).
_GPAD = 8


def adaptive_kernel_size(channels: int, gamma: int = 2, b: int = 1) -> int:
    """k = |log2(C)/gamma + b/gamma|, forced odd, clamped to [3, 9]."""
    k = int(abs(math.log2(channels) / gamma + b / gamma))
    if k % 2 == 0:
        k += 1
    return max(3, min(k, 9))


# ---------------------------------------------------------------------------
# In-kernel helpers
# ---------------------------------------------------------------------------
def _cross_channel_attention(gap, w_ref, gpad_ref, channels, kernel_size):
    """k-tap 1D conv over channels (same padding, no bias) + sigmoid.

    gap:      (C, 1) f32 value — per-channel means, channels on sublanes.
    w_ref:    (k,)   f32 SMEM ref — scalar-prefetched Conv1d weights.
    gpad_ref: (C + 2*_GPAD, 1) f32 VMEM scratch used as a zero-padded staging
              buffer so each tap is a plain shifted-window load
              (no CxC Toeplitz matrix, no MXU, no roll).
    Returns (C, 1) f32 attention weights in [0, 1].
    """
    pad = (kernel_size - 1) // 2
    gpad_ref[...] = jnp.zeros_like(gpad_ref)
    gpad_ref[_GPAD:_GPAD + channels, :] = gap
    att_raw = jnp.zeros((channels, 1), jnp.float32)
    for j in range(kernel_size):            # k <= 9, static unroll
        lo = _GPAD + j - pad
        att_raw = att_raw + w_ref[j] * gpad_ref[lo:lo + channels, :]
    return jax.nn.sigmoid(att_raw)


def _make_fused_kernel(channels, hw, kernel_size):
    """Single-pass ECA: GAP + conv + sigmoid + recalibration (1R + 1W)."""
    inv_hw = 1.0 / float(hw)

    def kernel(w_ref, x_ref, o_ref, gpad_ref):
        x = x_ref[0]                                            # (C, HW)
        # GAP over the lane (spatial) axis; accumulate in f32.
        gap = jnp.sum(x.astype(jnp.float32), axis=-1, keepdims=True) * inv_hw
        att = _cross_channel_attention(gap, w_ref, gpad_ref,
                                       channels, kernel_size)   # (C, 1) f32
        # Recalibration in the input dtype (bf16 stays bf16 on v6e/v7x).
        o_ref[0] = (x * att.astype(x.dtype)).astype(o_ref.dtype)

    return kernel


def _make_gap_att_kernel(channels, hw, kernel_size):
    """Pass 1 of the tiled path: streamed GAP accumulation, then conv+sigmoid."""
    inv_hw = 1.0 / float(hw)

    def kernel(w_ref, x_ref, att_ref, gpad_ref):
        t = pl.program_id(1)

        @pl.when(t == 0)
        def _init():
            att_ref[...] = jnp.zeros_like(att_ref)

        x = x_ref[0]                                            # (C, T)
        # Per-tile partial sums, f32 accumulator resident in the output block.
        att_ref[0] += jnp.sum(x.astype(jnp.float32), axis=-1, keepdims=True)

        @pl.when(t == pl.num_programs(1) - 1)
        def _finalize():
            gap = att_ref[0] * inv_hw                           # (C, 1) f32
            att_ref[0] = _cross_channel_attention(gap, w_ref, gpad_ref,
                                                  channels, kernel_size)

    return kernel


def _apply_att_kernel(x_ref, att_ref, o_ref):
    """Pass 2 of the tiled path: out = x * att, streamed tile by tile."""
    x = x_ref[0]                                                # (C, T)
    att = att_ref[0].astype(x.dtype)                            # (C, 1)
    o_ref[0] = (x * att).astype(o_ref.dtype)


# ---------------------------------------------------------------------------
# Host-side helpers
# ---------------------------------------------------------------------------
def _choose_spatial_tile(hw, c, itemsize, target_bytes):
    """Largest lane-dense (multiple-of-128) divisor of hw whose (C, T) block
    stays under target_bytes; falls back to the full spatial extent."""
    max_t = max(128, target_bytes // max(1, c * itemsize))
    if hw <= max_t:
        return hw
    best = 0
    t = 128
    while t <= max_t:
        if hw % t == 0:
            best = t
        t += 128
    return best if best else hw


def _vmem_limit(block_bytes):
    """Scoped VMEM budget: double-buffered in + out blocks + slack.  Raises the
    v5e 16 MiB default so pipelining survives; stays within v7x's 64 MiB."""
    need = 6 * block_bytes + (1 << 20)
    return int(min(64 * 1024 * 1024, max(32 * 1024 * 1024, need)))


# ---------------------------------------------------------------------------
# Public forward
# ---------------------------------------------------------------------------
def eca_forward(x_nchw: jnp.ndarray, conv_w: jnp.ndarray, *,
                block_target_bytes: int = 2 * 1024 * 1024,
                force_two_pass: bool = False) -> jnp.ndarray:
    """ECA forward.  x_nchw: [B, C, H, W].  conv_w: [k] Conv1d weights."""
    B, C, H, W = x_nchw.shape
    k = int(conv_w.shape[0])
    HW = H * W
    itemsize = jnp.dtype(x_nchw.dtype).itemsize

    # Free reshape (no transpose): channels -> sublanes, spatial -> lanes.
    x = x_nchw.reshape(B, C, HW)
    w = conv_w.astype(jnp.float32)

    gpad_shape = (C + 2 * _GPAD, 1)
    slab_bytes = C * HW * itemsize

    if (not force_two_pass) and slab_bytes <= block_target_bytes:
        # ---------------- fused single pass: 1R + 1W ----------------
        kernel = _make_fused_kernel(C, HW, k)
        out = pl.pallas_call(
            kernel,
            out_shape=jax.ShapeDtypeStruct((B, C, HW), x.dtype),
            grid_spec=pltpu.PrefetchScalarGridSpec(
                num_scalar_prefetch=1,
                grid=(B,),
                in_specs=[pl.BlockSpec((1, C, HW), lambda b, w_: (b, 0, 0))],
                out_specs=pl.BlockSpec((1, C, HW), lambda b, w_: (b, 0, 0)),
                scratch_shapes=[pltpu.VMEM(gpad_shape, jnp.float32)],
            ),
            compiler_params=pltpu.CompilerParams(
                dimension_semantics=("parallel",),
                vmem_limit_bytes=_vmem_limit(slab_bytes)),
            cost_estimate=pl.CostEstimate(
                flops=2 * B * C * HW + 2 * B * C * k,
                transcendentals=B * C,
                bytes_accessed=2 * B * C * HW * itemsize),
        )(w, x)
        return out.reshape(B, C, H, W)

    # ---------------- tiled two-pass path (2R + 1W) ----------------
    T = _choose_spatial_tile(HW, C, itemsize, block_target_bytes)
    nt = HW // T
    blk_bytes = C * T * itemsize

    # Pass 1: GAP accumulation over spatial tiles, conv + sigmoid at finalize.
    gap_kernel = _make_gap_att_kernel(C, HW, k)
    att = pl.pallas_call(
        gap_kernel,
        out_shape=jax.ShapeDtypeStruct((B, C, 1), jnp.float32),
        grid_spec=pltpu.PrefetchScalarGridSpec(
            num_scalar_prefetch=1,
            grid=(B, nt),
            in_specs=[pl.BlockSpec((1, C, T), lambda b, t, w_: (b, 0, t))],
            out_specs=pl.BlockSpec((1, C, 1), lambda b, t, w_: (b, 0, 0)),
            scratch_shapes=[pltpu.VMEM(gpad_shape, jnp.float32)],
        ),
        compiler_params=pltpu.CompilerParams(
            dimension_semantics=("parallel", "arbitrary"),
            vmem_limit_bytes=_vmem_limit(blk_bytes)),
        cost_estimate=pl.CostEstimate(
            flops=2 * B * C * HW + 2 * B * C * k,
            transcendentals=B * C,
            bytes_accessed=B * C * HW * itemsize + B * C * 4),
    )(w, x)

    # Pass 2: streamed recalibration multiply (both grid axes parallel so the
    # two v7x TensorCores share B * nt tiles even at batch size 1).
    out = pl.pallas_call(
        _apply_att_kernel,
        out_shape=jax.ShapeDtypeStruct((B, C, HW), x.dtype),
        grid=(B, nt),
        in_specs=[pl.BlockSpec((1, C, T), lambda b, t: (b, 0, t)),
                  pl.BlockSpec((1, C, 1), lambda b, t: (b, 0, 0))],
        out_specs=pl.BlockSpec((1, C, T), lambda b, t: (b, 0, t)),
        compiler_params=pltpu.CompilerParams(
            dimension_semantics=("parallel", "parallel"),
            vmem_limit_bytes=_vmem_limit(blk_bytes)),
        cost_estimate=pl.CostEstimate(
            flops=B * C * HW,
            transcendentals=0,
            bytes_accessed=2 * B * C * HW * itemsize + B * C * 4),
    )(x, att)
    return out.reshape(B, C, H, W)


# ---------------------------------------------------------------------------
# Pure-JAX reference of the PyTorch module semantics (verification only)
# ---------------------------------------------------------------------------
def eca_reference(x_nchw: jnp.ndarray, conv_w: jnp.ndarray) -> jnp.ndarray:
    B, C, H, W = x_nchw.shape
    k = conv_w.shape[0]
    pad = (k - 1) // 2
    gap = jnp.mean(x_nchw, axis=(2, 3))                        # (B, C)
    gap_p = jnp.pad(gap, ((0, 0), (pad, pad)))
    att_raw = jnp.zeros_like(gap)
    for j in range(k):
        att_raw = att_raw + conv_w[j] * gap_p[:, j:j + C]
    att = jax.nn.sigmoid(att_raw)                              # (B, C)
    return x_nchw * att[:, :, None, None]


if __name__ == "__main__":
    key = jax.random.PRNGKey(0)
    kx1, kw1, kx2, kw2 = jax.random.split(key, 4)

    # ---- Test 1: small shapes (fused single-pass path) ----
    B, C, H, W = 2, 4, 16, 16
    k = adaptive_kernel_size(C)                     # C=4 -> k=3
    x1 = jax.random.normal(kx1, (B, C, H, W), dtype=jnp.float32)
    # Kaiming-normal (fan_out, relu) for Conv1d weight (1,1,k): std = sqrt(2/k)
    w1 = jax.random.normal(kw1, (k,), dtype=jnp.float32) * jnp.sqrt(2.0 / k)

    out1 = jax.block_until_ready(eca_forward(x1, w1))
    ref1 = eca_reference(x1, w1)
    assert out1.shape == (B, C, H, W)
    assert jnp.allclose(out1, ref1, atol=1e-5, rtol=1e-5)

    # ---- Test 2: exercise the tiled two-pass path (k=5, multi-tile GAP) ----
    B2, C2, H2, W2 = 2, 256, 16, 16
    k2 = adaptive_kernel_size(C2)                   # C=256 -> k=5
    x2 = jax.random.normal(kx2, (B2, C2, H2, W2), dtype=jnp.float32)
    w2 = jax.random.normal(kw2, (k2,), dtype=jnp.float32) * jnp.sqrt(2.0 / k2)

    out2 = jax.block_until_ready(
        eca_forward(x2, w2, block_target_bytes=128 * 1024, force_two_pass=True))
    ref2 = eca_reference(x2, w2)
    assert out2.shape == (B2, C2, H2, W2)
    assert jnp.allclose(out2, ref2, atol=1e-5, rtol=1e-5)

    print("KERNEL_OK")
</pallas_src>

<mosaic_0001>
module attributes {stable_mosaic.version = 11 : i64} {
  func.func @kernel(%arg0: i32, %arg1: memref<3xf32, #tpu.memory_space<smem>>, %arg2: memref<1x4x256xf32, #tpu.memory_space<vmem>>, %arg3: memref<1x4x256xf32, #tpu.memory_space<vmem>>, %arg4: memref<20x1xf32, #tpu.memory_space<vmem>>) attributes {dimension_semantics = [#tpu.dimension_semantics<parallel>], iteration_bounds = array<i64: 2>, scalar_prefetch = 1 : i64, scratch_operands = 1 : i64, tpu.core_type = #tpu.core_type<tc>, window_params = [{transform_indices = @transform_0, window_bounds = array<i64: 1, 4, 256>}, {transform_indices = @transform_1, window_bounds = array<i64: 1, 4, 256>}]} {
    %c0 = arith.constant 0 : index
    %c0_0 = arith.constant 0 : index
    %c0_1 = arith.constant 0 : index
    %0 = vector.load %arg2[%c0, %c0_0, %c0_1] : memref<1x4x256xf32, #tpu.memory_space<vmem>>, vector<1x4x256xf32>
    %1 = vector.shape_cast %0 : vector<1x4x256xf32> to vector<4x256xf32>
    %cst = arith.constant dense<0.000000e+00> : vector<4xf32>
    %2 = vector.multi_reduction <add>, %1, %cst [1] : vector<4x256xf32> to vector<4xf32>
    %3 = vector.shape_cast %2 : vector<4xf32> to vector<4x1xf32>
    %cst_2 = arith.constant 3.906250e-03 : f32
    %4 = vector.broadcast %cst_2 : f32 to vector<4x1xf32>
    %5 = arith.mulf %3, %4 : vector<4x1xf32>
    %cst_3 = arith.constant 0.000000e+00 : f32
    %6 = vector.broadcast %cst_3 : f32 to vector<20x1xf32>
    %c0_4 = arith.constant 0 : index
    %c0_5 = arith.constant 0 : index
    %7 = vector.load %arg4[%c0_4, %c0_5] : memref<20x1xf32, #tpu.memory_space<vmem>>, vector<20x1xf32>
    tpu.vector_store %arg4[%c0_4, %c0_5], %6 {strides = array<i32>} : memref<20x1xf32, #tpu.memory_space<vmem>>, vector<20x1xf32>,
    %c8 = arith.constant 8 : index
    %c0_6 = arith.constant 0 : index
    %8 = vector.load %arg4[%c8, %c0_6] : memref<20x1xf32, #tpu.memory_space<vmem>>, vector<4x1xf32>
    tpu.vector_store %arg4[%c8, %c0_6], %5 {strides = array<i32>} : memref<20x1xf32, #tpu.memory_space<vmem>>, vector<4x1xf32>,
    %cst_7 = arith.constant 0.000000e+00 : f32
    %9 = vector.broadcast %cst_7 : f32 to vector<4x1xf32>
    %c0_8 = arith.constant 0 : index
    %10 = memref.load %arg1[%c0_8] : memref<3xf32, #tpu.memory_space<smem>>
    %c7 = arith.constant 7 : index
    %c0_9 = arith.constant 0 : index
    %11 = vector.load %arg4[%c7, %c0_9] : memref<20x1xf32, #tpu.memory_space<vmem>>, vector<4x1xf32>
    %12 = vector.broadcast %10 : f32 to vector<4x1xf32>
    %13 = arith.mulf %12, %11 : vector<4x1xf32>
    %14 = arith.addf %9, %13 : vector<4x1xf32>
    %c1 = arith.constant 1 : index
    %15 = memref.load %arg1[%c1] : memref<3xf32, #tpu.memory_space<smem>>
    %c8_10 = arith.constant 8 : index
    %c0_11 = arith.constant 0 : index
    %16 = vector.load %arg4[%c8_10, %c0_11] : memref<20x1xf32, #tpu.memory_space<vmem>>, vector<4x1xf32>
    %17 = vector.broadcast %15 : f32 to vector<4x1xf32>
    %18 = arith.mulf %17, %16 : vector<4x1xf32>
    %19 = arith.addf %14, %18 : vector<4x1xf32>
    %c2 = arith.constant 2 : index
    %20 = memref.load %arg1[%c2] : memref<3xf32, #tpu.memory_space<smem>>
    %c9 = arith.constant 9 : index
    %c0_12 = arith.constant 0 : index
    %21 = vector.load %arg4[%c9, %c0_12] : memref<20x1xf32, #tpu.memory_space<vmem>>, vector<4x1xf32>
    %22 = vector.broadcast %20 : f32 to vector<4x1xf32>
    %23 = arith.mulf %22, %21 : vector<4x1xf32>
    %24 = arith.addf %19, %23 : vector<4x1xf32>
    %25 = arith.negf %24 : vector<4x1xf32>
    %26 = math.exp %25 : vector<4x1xf32>
    %cst_13 = arith.constant 1.000000e+00 : f32
    %27 = vector.broadcast %cst_13 : f32 to vector<4x1xf32>
    %28 = arith.addf %27, %26 : vector<4x1xf32>
    %29 = arith.divf %27, %28 : vector<4x1xf32>
    %30 = vector.broadcast %29 : vector<4x1xf32> to vector<4x256xf32>
    %31 = arith.mulf %1, %30 : vector<4x256xf32>
    %c0_14 = arith.constant 0 : index
    %c0_15 = arith.constant 0 : index
    %c0_16 = arith.constant 0 : index
    %32 = vector.load %arg3[%c0_14, %c0_15, %c0_16] : memref<1x4x256xf32, #tpu.memory_space<vmem>>, vector<1x4x256xf32>
    %33 = vector.shape_cast %32 : vector<1x4x256xf32> to vector<4x256xf32>
    %34 = vector.shape_cast %31 : vector<4x256xf32> to vector<1x4x256xf32>
    tpu.vector_store %arg3[%c0_14, %c0_15, %c0_16], %34 {strides = array<i32>} : memref<1x4x256xf32, #tpu.memory_space<vmem>>, vector<1x4x256xf32>,
    return
  }
  func.func @transform_0(%arg0: i32, %arg1: memref<3xf32, #tpu.memory_space<smem>>) -> (i32, i32, i32) {
    %c0_i32 = arith.constant 0 : i32
    %c0_i32_0 = arith.constant 0 : i32
    %c0_i32_1 = arith.constant 0 : i32
    return %arg0, %c0_i32, %c0_i32_0 : i32, i32, i32
  }
  func.func @transform_1(%arg0: i32, %arg1: memref<3xf32, #tpu.memory_space<smem>>) -> (i32, i32, i32) {
    %c0_i32 = arith.constant 0 : i32
    %c0_i32_0 = arith.constant 0 : i32
    %c0_i32_1 = arith.constant 0 : i32
    return %arg0, %c0_i32, %c0_i32_0 : i32, i32, i32
  }
}

</mosaic_0001>

<bundles_post_ra>
// kernel: tpu_custom_call.1
= control target key start
LH: loop header
LB: loop body
LE: loop exit
PB: predicated region body
PF: predicated region fallthrough
CT: control target
= control target key end

     0   :  { %s659_s0 = inlined_call_operand.hbm [shape: f32[3], index: 0, kind: input, shape index: {}]   ;;  %s660_s1 = inlined_call_operand.hbm [shape: f32[2,4,256], index: 1, kind: input, shape index: {}]   ;;  %s661_s2 = inlined_call_operand.hbm [shape: f32[2,4,256], index: 2, kind: output, shape index: {}]  }
   0x1   :  { %s350_s11 = scalar_lea.hbm %s659_s0, 16 }
   0x2   :  { %p351_p0 = scmp.ne.s32.totalorder %s659_s0, %s350_s11  ;;  %p354_p1 = scmp.lt.u32.totalorder %s350_s11, %s659_s0 }
   0x4   :  { %p356_p2 = pnand %p354_p1, %p351_p0 }
   0x6   :  { %359 = shalt.err (!%p356_p2)  }
   0x7   :  { %s460_s16 = smov [#allocation4]  }
   0x8   :  { %8 = dma.hbm_to_smem %s659_s0, 16, %s460_s16, [#allocation3] }
   0x9   :  { %434 = dma.done.wait [#allocation3], 16 }
   0xa   :  { %435 = vsyncadd [#allocation3], 4294967280 }
   0xb   :  { %10 = sfence }
   0xc   :  { %11 = vsyncpa [#allocation6], 0 }
   0xd   :  { %13 = vsyncpa [#allocation6 + $0x1], 0 }
   0xe   :  { %14 = vsyncpa [#allocation7], 0 }
   0xf   :  { %16 = vsyncpa [#allocation7 + $0x1], 0  ;;  %s493_s19 = smov 0   ;;  %s495_s20 = smov 0  }
  0x10   :  { %s497_s21 = smov 0   ;;  %s499_s22 = smov 0  }
  0x11 LB: > { %s514_s0 = sadd.s32 4294967295, %s458_s22   ;;  %s275_s23 = sadd.s32 4294967294, %s458_s22   ;;  %s458_s22 = sphi %s499_s22, %s676_s22   ;;  %s454_s21 = sphi %s497_s21, %s675_s21   ;;  %s450_s20 = sphi %s495_s20, %s674_s20   ;;  %s446_s19 = sphi %s493_s19, %s673_s19  }
  0x12   : > { %s518_s24 = sadd.s32 1, %s458_s22   ;;  %s29_s25 = sadd.s32 1, %s454_s21 }
  0x13   : > { %s26_s26 = ssub.s32 %s458_s22, %s518_s24  ;;  %p36_p3 = scmp.ne.s32.totalorder %s454_s21, %s450_s20 }
  0x14   : > { %p27_p4 = scmp.eq.s32.totalorder %s26_s26, 0  ;;  %p37_p5 = scmp.eq.s32.totalorder %s458_s22, 0 }
  0x15   : > { %p42_p6 = scmp.ne.s32.totalorder %s450_s20, %s446_s19  ;;  %p43_p7 = scmp.eq.s32.totalorder %s514_s0, 0 }
  0x16   : > { %s530_s27 = scalar_select %p27_p4, %s454_s21, %s29_s25  }
  0x17   : > { %p532_p8 = por %p37_p5, %p36_p3  ;;  %p536_p9 = por %p43_p7, %p42_p6 }
  0x18   : > { %p66_p10 = scmp.eq.s32.totalorder %s514_s0, 1  ;;  %p72_p11 = scmp.eq.s32.totalorder %s275_s23, 1 }
  0x19   : > { %p306_p13 = scmp.lt.s32.totalorder %s458_s22, 2  ;;  %s92_s4 = sand.u32 1, %s454_s21  }
  0x1a   : > { %p543_p0 = por %p66_p10, %p36_p3  ;;  %p547_p1 = por %p72_p11, %p42_p6 }
  0x1b   : > { %s292_s5 = sshll.u32 %s458_s22, 7  ;;  %s278_s6 = sshll.u32 %s92_s4, 3 }
  0x1c   : > { %s665_s30 = scalar_select %p543_p0, 1, 0 }
  0x1d   : > { %s666_s3 = scalar_select %p547_p1, 1, 0 }
  0x1e   : > { %s556_s9 = scalar_lea.hbm %s660_s1, %s292_s5  ;;  %s96_s10 = scalar_lea.vmem [#allocation5], %s278_s6 }
  0x1f   : > { %s104_s11 = sshll.u32 %s96_s10, 4  ;;  %p560_p2 = pnand %p306_p13, %p532_p8  ;;  %s564_s11 = int_to_ptr.vmem [resolvable:$true] %s104_s11 }
  0x20   : > { %s93_s13 = scalar_lea.sflag [#allocation6], %s92_s4  ;;  %s360_s14 = scalar_lea.hbm %s556_s9, 128 }
  0x21   : > { %p361_p5 = scmp.ne.s32.totalorder %s556_s9, %s360_s14  ;;  %p362_p6 = pneg %p560_p2 }
  0x22   : > { %s365_s17 = scalar_lea.hbm %s660_s1, 256  ;;  %p366_p8 = scmp.lt.u32.totalorder %s556_s9, %s660_s1 }
  0x23   : > { %p363_p7 = pnand %p362_p6, %p361_p5  ;;  %p367_p11 = scmp.lt.u32.totalorder %s365_s17, %s360_s14 }
  0x24   : > { %p369_p12 = scmp.lt.u32.totalorder %s360_s14, %s556_s9 }
  0x25   : > { %p364_p10 = pneg %p363_p7  ;;  %p368_p13 = por %p367_p11, %p366_p8 }
  0x27   : > { %p370_p3 = por %p369_p12, %p368_p13 }
  0x29   : > { %p371_p4 = pnand %p370_p3, %p364_p10 }
  0x2b   : > { %374 = shalt.err (!%p371_p4)
}
  0x2c   : > { %s375_s25 = scalar_lea.vmem %s564_s11, 128  ;;  %s461_s26 = smov [#allocation5]  }
  0x2d   : > { %p376_p5 = scmp.ne.s32.totalorder %s564_s11, %s375_s25  ;;  %s380_s28 = sshll.u32 %s461_s26, 4  ;;  %s381_s28 = int_to_ptr.vmem [resolvable:$false] %s380_s28 }
  0x2e   : > { %s382_s4 = scalar_lea.vmem %s381_s28, 256  ;;  %p383_p0 = scmp.lt.s32.totalorder %s564_s11, %s381_s28 }
  0x2f   : > { %p378_p7 = pnand %p376_p5, %p362_p6  ;;  %p384_p8 = scmp.lt.s32.totalorder %s382_s4, %s375_s25 }
  0x31   : > { %p379_p1 = pneg %p378_p7  ;;  %p385_p11 = por %p384_p8, %p383_p0 }
  0x33   : > { %p386_p12 = pnand %p385_p11, %p379_p1 }
  0x35   : > { %389 = shalt.err (!%p386_p12)
}
  0x36   : > { %301 = dma.hbm_to_vmem [thread:$0]  (!%p560_p2), %s556_s9, 128, %s564_s11, %s93_s13  }
  0x37   : > { %p668_p3 = scmp.lt.s32.totalorder %s458_s22, 3  ;;  %p669_p4 = scmp.ge.s32.totalorder %s458_s22, 1 }
  0x39   : > { %p110_p6 = pnand %p669_p4, %p668_p3 }
  0x3a   : > { %s598_s5 = sand.u32 (!%p110_p6), 1, %s450_s20  }
  0x3b   : > { %113 = sbr.rel (%p110_p6) target bundleno = 404 (0x194), region = 24  ;;  %s282_s6 = sshll.u32 (!%p110_p6), %s598_s5, 3 }
  0x3c   : > { %s116_s7 = scalar_lea.sflag (!%p110_p6), [#allocation6], %s598_s5  ;;  %s119_s8 = scalar_lea.vmem (!%p110_p6), [#allocation5], %s282_s6 }
  0x42   : > { %437 = dma.done.wait (%p536_p9), %s116_s7, 128  }
  0x43   : > { %439 = vsyncadd (%p536_p9), %s116_s7, 4294967168  ;;  %vm149_vm0 = vcmask 7168   ;;  %vm152_vm1 = vcmask 3072   ;;  %v462_v0 = vmov 0.0   ;;  %vm142_vm2 = vcmask 1043456   ;;  %v138_v1 = vld [vmem:[%s119_s8] sm:$0xff] }
  0x44   : > { %150 = vst.msk [vmem:[#allocation2] sm:$0xff] %vm149_vm0, %v462_v0  ;;  %151 = vst.msk [vmem:[#allocation2 + $0x8] sm:$0xff] %vm149_vm0, %v462_v0  ;;  %v140_v2 = vcombine.high %v138_v1, %v138_v1  ;;  %v143_v3 = vsel %vm142_vm2, %v138_v1, 0.0  ;;  %v463_v6 = vmov 0   ;;  %s155_s9 = sld [smem:[#allocation4]]  ;;  %s284_s10 = sld [smem:[#allocation4 + $0x1]]  ;;  %v183_v26 = vlaneseq }
  0x45   : > { %344 = vset.pattern.permute.xlu0 %v463_v6  ;;  %s285_s29 = sld [smem:[#allocation4 + $0x2]]  ;;  %v464_v24 = vmov 839922192   ;;  %s293_s11 = sshll.u32 %s514_s0, 7 }
  0x46   : > { %v144_v4 = vsel %vm142_vm2, %v140_v2, 0.0  ;;  %v181_v25 = vunpack.c.l.s4 %v464_v24  ;;  %v184_v28 = vshrl.u32 %v183_v26, 7  ;;  %s137_s12 = scalar_lea.vmem [#allocation8], %s282_s6  ;;  %s615_s16 = scalar_lea.hbm %s661_s2, %s293_s11 }
  0x47   : > { %v145_v5 = vadd.f32 %v144_v4, %v143_v3  ;;  %s205_s13 = sshll.u32 %s137_s12, 4  ;;  %s191_s17 = scalar_lea.sflag [#allocation7], %s598_s5  ;;  %s617_s13 = int_to_ptr.vmem [resolvable:$true] %s205_s13 }
  0x48   : > { %v182_v27 = vunpack.c.0.s8 %v181_v25  ;;  %s390_s18 = scalar_lea.vmem %s617_s13, 128  ;;  %p670_p0 = scmp.ne.s32.totalorder %s665_s30, 0 }
  0x49   : > { %146 = vadd.xlane.f32.xlu0 %v145_v5  ;;  %p391_p9 = scmp.ne.s32.totalorder %s617_s13, %s390_s18  ;;  %s465_s0 = smov [#allocation8]  }
  0x4a   : > { %v157_v9 = vstv %s155_s9  ;;  %v162_v10 = vstv %s284_s10  ;;  %v185_v29 = vsub.s32 %v182_v27, %v184_v28  ;;  %s394_s23 = sshll.u32 %s465_s0, 4  ;;  %s395_s23 = int_to_ptr.vmem [resolvable:$false] %s394_s23 }
  0x4b   : > { %v167_v14 = vstv %s285_s29  ;;  %p392_p1 = pnand %p391_p9, %p670_p0  ;;  %s396_s25 = scalar_lea.vmem %s395_s23, 256 }
  0x4c   : > { %p397_p10 = scmp.lt.s32.totalorder %s617_s13, %s395_s23  ;;  %p398_p13 = scmp.lt.s32.totalorder %s396_s25, %s390_s18 }
  0x4d   : > { %p393_p2 = pneg %p392_p1 }
  0x4e   : > { %p399_p5 = por %p398_p13, %p397_p10 }
  0x50   : > { %p400_p7 = pnand %p399_p5, %p393_p2 }
  0xd6   : > { %v147_v7 = vpop.xlane.xlu0 %146 }
  0xd7   : > { %v148_v8 = vmul.f32 0.00390625, %v147_v7 }
  0xd9   : > { %154 = vst.msk [vmem:[#allocation2 + $0x8] sm:$0xf] %vm152_vm1, %v148_v8 }
  0xe0   : > { %v156_v11 = vld [vmem:[#allocation2 + $0x7] sm:$0xf] }
  0xe1   : > { %v161_v12 = vld [vmem:[#allocation2 + $0x8] sm:$0xf]  ;;  %v158_v15 = vmul.f32 %v157_v9, %v156_v11 }
  0xe2   : > { %v166_v13 = vld [vmem:[#allocation2 + $0x9] sm:$0xf]  ;;  %v163_v16 = vmul.f32 %v162_v10, %v161_v12 }
  0xe3   : > { %v168_v18 = vmul.f32 %v167_v14, %v166_v13 }
  0xe4   : > { %v164_v17 = vadd.f32 %v163_v16, %v158_v15 }
  0xe6   : > { %v169_v19 = vadd.f32 %v168_v18, %v164_v17 }
  0xe8   : > { %v286_v20 = vmul.f32 -1.442695, %v169_v19 }
  0xea   : > { %346 = vpow2.f32 %v286_v20 }
  0xf4   : > { %v347_v21 = vpop.eup %346 }
  0xf5   : > { %v173_v22 = vadd.f32 1.0, %v347_v21 }
  0xf7   : > { %348 = vrcp.f32 %v173_v22 }
 0x101   : > { %v349_v23 = vpop.eup %348 }
 0x102   : > { %178 = vperm.xlu0 %344, %v349_v23  }
 0x181   : > { %v179_v30 = vpop.permute.xlu0 %178 }
 0x182   : > { %v186_v31 = vrot.slane %v179_v30, %v185_v29 }
 0x184   : > { %v188_v32 = vmul.f32 %v186_v31, %v138_v1 }
 0x186   : > { %189 = vst [vmem:[%s137_s12] sm:$0xff] %v188_v32 }
 0x187   : > { %403 = shalt.err (!%p400_p7)
}
 0x188   : > { %s404_s26 = scalar_lea.hbm %s615_s16, 128  ;;  %s408_s5 = scalar_lea.hbm %s661_s2, 256 }
 0x189   : > { %p405_p8 = scmp.ne.s32.totalorder %s615_s16, %s404_s26  ;;  %p409_p3 = scmp.lt.u32.totalorder %s615_s16, %s661_s2 }
 0x18a   : > { %p410_p4 = scmp.lt.u32.totalorder %s408_s5, %s404_s26  ;;  %p412_p9 = scmp.lt.u32.totalorder %s404_s26, %s615_s16 }
 0x18b   : > { %p406_p11 = pnand %p405_p8, %p670_p0 }
 0x18c   : > { %p411_p6 = por %p410_p4, %p409_p3 }
 0x18d   : > { %p407_p12 = pneg %p406_p11 }
 0x18e   : > { %p413_p1 = por %p412_p9, %p411_p6 }
 0x190   : > { %p414_p2 = pnand %p413_p1, %p407_p12 }
 0x192   : > { %417 = shalt.err (!%p414_p2)
}
 0x193   : > { %296 = dma.vmem_to_hbm [thread:$0]  (%p670_p0), %s617_s13, 128, %s615_s16, %s191_s17  }
 0x194 PF: > { %s217_s8 = sand.u32 1, %s446_s19   ;;  %p671_p10 = scmp.ne.s32.totalorder %s666_s3, 0 }
 0x195   : > { %p672_p13 = scmp.ge.s32.totalorder %s458_s22, 2  ;;  %s218_s9 = scalar_lea.sflag [#allocation7], %s217_s8 }
 0x197   : > { %p303_p5 = pnand %p672_p13, %p671_p10 }
 0x199   : > { %441 = dma.done.wait (!%p303_p5), %s218_s9, 128  }
 0x19a   : > { %443 = vsyncadd (!%p303_p5), %s218_s9, 4294967168  ;;  %p19_p7 = scmp.ge.s32.totalorder %s518_s24, 4   ;;  %s673_s19 = smov %s450_s20 }
 0x19b   : > { %s674_s20 = smov %s454_s21  ;;  %s675_s21 = smov %s530_s27 }
 0x19c   : > { %s676_s22 = smov %s518_s24  ;;  %21 = sbr.rel (!%p19_p7) target bundleno = 17 (0x11), region = 69 }
 0x1a3   :  { %223 = vsyncpa [#allocation6], 1 }
 0x1a4   :  { %225 = vsyncpa [#allocation6 + $0x1], 1 }
 0x1a5   :  { %226 = vsyncpa [#allocation7], 1 }
 0x1a6   :  { %228 = vsyncpa [#allocation7 + $0x1], 1 }

</bundles_post_ra>
